<compile_context>
chip_gen: v5e
topology: v5e:2x2
jax: 0.10.0
libtpu: 0.0.40
codegen_flags: <defaults>
</compile_context>

<pallas_src>
import jax
import jax.numpy as jnp
from jax.experimental import pallas as pl
from jax.experimental.pallas import tpu as pltpu


_VMEM_LIMIT_BYTES = 48 * 1024 * 1024     # < v7x 64 MiB physical, > all defaults we need.
_FUSED_MAX_F32_BYTES = 2 << 20           # fused path: whole tensor (as f32) <= 2 MiB.


def _apply_kernel(s_ref, w_ref, o_ref):
    """Element-wise auto_prune apply (mean already folded into inv_scale).

    s_ref (SMEM, f32[5]) = [alpha/beta, beta, 1/(mean_abs*gamma), max_ratio, eps]
    """
    a_over_b = s_ref[0]
    beta = s_ref[1]
    inv_scale = s_ref[2]
    ratio = s_ref[3]
    eps = s_ref[4]

    w = w_ref[...]
    # Cheap ops in native dtype (bf16 packs 2 elems/lane on v6e/v7x); keep the
    # transcendental log and the mask math in f32 for precision.
    if w_ref.dtype == jnp.bfloat16:
        cdt = jnp.bfloat16
    else:
        cdt = jnp.float32
    w = w.astype(cdt)
    w_abs = jnp.abs(w)
    scaled = jnp.maximum(eps.astype(cdt), w_abs * inv_scale.astype(cdt))
    log_w = jnp.log(scaled.astype(jnp.float32))
    log_w = jnp.minimum(ratio, beta * log_w)
    mask = jnp.maximum(a_over_b * log_w, log_w)
    o_ref[...] = (w * mask.astype(cdt)).astype(o_ref.dtype)


def _fused_kernel(s_ref, w_ref, o_ref):
    """Single-pass auto_prune: in-kernel mean(|w|) + apply (VMEM-resident block).

    s_ref (SMEM, f32[5]) = [alpha/beta, beta, gamma, max_ratio, eps]
    """
    a_over_b = s_ref[0]
    beta = s_ref[1]
    gamma = s_ref[2]
    ratio = s_ref[3]
    eps = s_ref[4]

    w = w_ref[...].astype(jnp.float32)
    w_abs = jnp.abs(w)
    mean_abs = jnp.mean(w_abs)
    # NOTE: mean_abs == 0 (all-zero weights) -> inf/NaN, same as the PyTorch
    # reference (parity, not guarded).
    inv_scale = 1.0 / (mean_abs * gamma)
    log_w = jnp.log(jnp.maximum(eps, w_abs * inv_scale))
    log_w = jnp.minimum(ratio, beta * log_w)
    mask = jnp.maximum(a_over_b * log_w, log_w)
    o_ref[...] = (w * mask).astype(o_ref.dtype)


def _apply_jax(w, a_over_b, beta, inv_scale, ratio, eps):
    """Pure-JAX elementwise apply — used only for the <width ragged tail."""
    w32 = w.astype(jnp.float32)
    log_w = jnp.log(jnp.maximum(eps, jnp.abs(w32) * inv_scale))
    log_w = jnp.minimum(ratio, beta * log_w)
    mask = jnp.maximum(a_over_b * log_w, log_w)
    return (w32 * mask).astype(w.dtype)


def pruner_forward(w, params, *, prune=True, block_bytes=4 << 20, fused=None):
    """Pallas implementation of Pruner.forward (method='auto_prune').

    params = [alpha, beta, gamma, max_ratio, eps] (already softplus'd).
    fused: None = auto (single-pass kernel when the tensor fits VMEM),
           False = force the tiled two-pass path, True = force fused.
    """
    if not prune:
        return w

    orig_shape = w.shape
    orig_dtype = w.dtype
    numel = int(w.size)
    itemsize = jnp.dtype(orig_dtype).itemsize

    alpha, beta, gamma, ratio, eps = (params[i] for i in range(5))
    a_over_b = alpha / beta

    # Lane-dense slab layout: rows x width with width a multiple of 128.
    width = 1024 if numel % 1024 == 0 else 128
    main_numel = (numel // width) * width
    tail_numel = numel - main_numel          # < width; nonzero only if numel % 128 != 0
    rows = main_numel // width

    if rows == 0:
        # Tiny tensor with no lane-aligned prefix -> pure JAX.
        mean_abs = jnp.mean(jnp.abs(w).astype(jnp.float32))
        inv_scale = 1.0 / (mean_abs * gamma)
        return _apply_jax(w, a_over_b, beta, inv_scale, ratio, eps)

    flat = w.reshape(-1)
    if tail_numel:
        w_main = flat[:main_numel]
        w_tail = flat[main_numel:]
    else:
        w_main = flat
        w_tail = None
    w2d = w_main.reshape(rows, width)

    if fused is None:
        use_fused = (tail_numel == 0) and (numel * 4 <= _FUSED_MAX_F32_BYTES)
    else:
        use_fused = bool(fused) and (tail_numel == 0)

    if use_fused:
        scalars = jnp.stack(
            [a_over_b, beta, gamma, ratio, eps]).astype(jnp.float32)
        out2d = pl.pallas_call(
            _fused_kernel,
            out_shape=jax.ShapeDtypeStruct((rows, width), orig_dtype),
            grid_spec=pltpu.PrefetchScalarGridSpec(
                num_scalar_prefetch=0,
                grid=(1,),
                in_specs=[
                    pl.BlockSpec(memory_space=pltpu.MemorySpace.SMEM),
                    # Block == full array -> exempt from the (8,128) rule.
                    pl.BlockSpec((rows, width), lambda i: (0, 0)),
                ],
                out_specs=pl.BlockSpec((rows, width), lambda i: (0, 0)),
            ),
            compiler_params=pltpu.CompilerParams(
                dimension_semantics=("arbitrary",),
                vmem_limit_bytes=_VMEM_LIMIT_BYTES),
            cost_estimate=pl.CostEstimate(
                flops=12 * numel,
                transcendentals=numel,
                bytes_accessed=2 * numel * itemsize),
        )(scalars, w2d)
        return out2d.reshape(orig_shape)

    # ----- Tiled two-pass path -----
    # Exact tree-reduced mean over the FULL tensor (single XLA HBM pass).
    mean_abs = jnp.mean(jnp.abs(w).astype(jnp.float32))
    inv_scale = 1.0 / (mean_abs * gamma)
    scalars = jnp.stack(
        [a_over_b, beta, inv_scale, ratio, eps]).astype(jnp.float32)

    # ~block_bytes per input block; rows a multiple of 32 so the block shape
    # satisfies (8,128)/(16,128)/(32,128) tiling for f32/bf16/int8.  The last
    # block may be partial (Pallas masks the edge) -> no pad / slice copies.
    target_rows = max(32, (block_bytes // (width * itemsize)) // 32 * 32)
    if rows > target_rows:
        block_rows = target_rows
    elif rows >= 64:
        # Split mid-size tensors into 2 blocks so the "parallel" grid axis can
        # shard across both TensorCores on v7x.
        block_rows = ((rows + 1) // 2 + 31) // 32 * 32
    else:
        block_rows = rows        # single full-extent block (exempt from 8-div)
    grid_rows = pl.cdiv(rows, block_rows)

    out2d = pl.pallas_call(
        _apply_kernel,
        out_shape=jax.ShapeDtypeStruct((rows, width), orig_dtype),
        grid_spec=pltpu.PrefetchScalarGridSpec(
            num_scalar_prefetch=0,
            grid=(grid_rows,),
            in_specs=[
                pl.BlockSpec(memory_space=pltpu.MemorySpace.SMEM),
                pl.BlockSpec((block_rows, width), lambda i: (i, 0)),
            ],
            out_specs=pl.BlockSpec((block_rows, width), lambda i: (i, 0)),
        ),
        compiler_params=pltpu.CompilerParams(
            dimension_semantics=("parallel",),
            vmem_limit_bytes=_VMEM_LIMIT_BYTES),
        cost_estimate=pl.CostEstimate(
            flops=10 * numel,
            transcendentals=numel,
            bytes_accessed=2 * numel * itemsize),
    )(scalars, w2d)

    out_flat = out2d.reshape(-1)
    if tail_numel:
        tail_out = _apply_jax(w_tail, a_over_b, beta, inv_scale, ratio, eps)
        out_flat = jnp.concatenate([out_flat, tail_out])
    return out_flat.reshape(orig_shape)


def init_auto_prune_params(alpha=0.01, beta=1.0, gamma=1.0, max_ratio=1.0,
                           eps=1e-12):
    """Replicates Pruner.__init__ for method='auto_prune'.

    Parameters are stored as log(exp(x) - 1); forward applies softplus.
    Returns the post-softplus values [alpha, beta, gamma, max_ratio, eps].
    """
    raw = jnp.log(jnp.expm1(
        jnp.array([alpha, beta, gamma, max_ratio], dtype=jnp.float32)))
    sp = jax.nn.softplus(raw)  # recovers [alpha, beta, gamma, max_ratio]
    return jnp.concatenate([sp, jnp.array([eps], dtype=jnp.float32)])


def pruner_reference(w, params):
    """Pure-JAX reference (mirrors the PyTorch forward)."""
    alpha, beta, gamma, ratio, eps = (params[i] for i in range(5))
    w32 = w.astype(jnp.float32)
    w_abs = jnp.abs(w32)
    log_w = jnp.log(jnp.maximum(eps, w_abs / (jnp.mean(w_abs) * gamma)))
    log_w = jnp.minimum(ratio, beta * log_w)
    mask = jnp.maximum(alpha / beta * log_w, log_w)
    return (w32 * mask).astype(w.dtype)


# TODO(synk): 'surgery' method keeps a stateful persistent mask buffer
# (self._mask mutated across calls); only the default 'auto_prune' path is
# implemented in the kernel.


if __name__ == "__main__":
    key = jax.random.PRNGKey(0)
    k1, k2, k3, k4 = jax.random.split(key, 4)
    params = init_auto_prune_params()

    # 1) Small conv-weight-like f32 tensor -> fused single-pass path.
    x = jax.random.normal(k1, (2, 4, 16, 16), dtype=jnp.float32)
    out = jax.block_until_ready(pruner_forward(x, params))
    ref = pruner_reference(x, params)
    assert out.shape == x.shape and out.dtype == x.dtype
    assert jnp.allclose(out, ref, rtol=1e-5, atol=1e-5), (
        float(jnp.max(jnp.abs(out - ref))))

    # 2) Same tensor through the tiled two-pass path (single full-extent block).
    out_tiled = jax.block_until_ready(pruner_forward(x, params, fused=False))
    assert jnp.allclose(out_tiled, ref, rtol=1e-5, atol=1e-5)

    # 3) Larger f32 slab, tiled path with a *partial* final block (2 blocks).
    y = jax.random.normal(k2, (100, 1024), dtype=jnp.float32)
    out_y = jax.block_until_ready(pruner_forward(y, params, fused=False))
    ref_y = pruner_reference(y, params)
    assert jnp.allclose(out_y, ref_y, rtol=1e-5, atol=1e-5)

    # 4) bf16, lane-ragged shape -> tiled path + pure-JAX tail, bf16 compute.
    z = jax.random.normal(k3, (3, 7, 11), dtype=jnp.bfloat16)
    out_z = jax.block_until_ready(pruner_forward(z, params))
    ref_z = pruner_reference(z, params)
    assert out_z.shape == z.shape and out_z.dtype == z.dtype
    assert jnp.allclose(out_z.astype(jnp.float32), ref_z.astype(jnp.float32),
                        rtol=5e-2, atol=5e-2)

    # 5) Tiny tensor (< 128 elements) -> pure-JAX fallback.
    t = jax.random.normal(k4, (5, 7), dtype=jnp.float32)
    out_t = jax.block_until_ready(pruner_forward(t, params))
    ref_t = pruner_reference(t, params)
    assert jnp.allclose(out_t, ref_t, rtol=1e-5, atol=1e-5)

    print("KERNEL_OK")
</pallas_src>

<mosaic_0001>
module attributes {stable_mosaic.version = 11 : i64} {
  func.func @_fused_kernel(%arg0: i32, %arg1: memref<5xf32, #tpu.memory_space<smem>>, %arg2: memref<2x1024xf32, #tpu.memory_space<vmem>>, %arg3: memref<2x1024xf32, #tpu.memory_space<vmem>>) attributes {dimension_semantics = [#tpu.dimension_semantics<arbitrary>], iteration_bounds = array<i64: 1>, scalar_prefetch = 0 : i64, scratch_operands = 0 : i64, tpu.core_type = #tpu.core_type<tc>, window_params = [{transform_indices = @transform_0, window_bounds = array<i64: 5>}, {pipeline_mode = #tpu.pipeline_mode<synchronous>, transform_indices = @transform_1, window_bounds = array<i64: 2, 1024>}, {pipeline_mode = #tpu.pipeline_mode<synchronous>, transform_indices = @transform_2, window_bounds = array<i64: 2, 1024>}]} {
    %c0 = arith.constant 0 : index
    %0 = memref.load %arg1[%c0] : memref<5xf32, #tpu.memory_space<smem>>
    %c1 = arith.constant 1 : index
    %1 = memref.load %arg1[%c1] : memref<5xf32, #tpu.memory_space<smem>>
    %c2 = arith.constant 2 : index
    %2 = memref.load %arg1[%c2] : memref<5xf32, #tpu.memory_space<smem>>
    %c3 = arith.constant 3 : index
    %3 = memref.load %arg1[%c3] : memref<5xf32, #tpu.memory_space<smem>>
    %c4 = arith.constant 4 : index
    %4 = memref.load %arg1[%c4] : memref<5xf32, #tpu.memory_space<smem>>
    %c0_0 = arith.constant 0 : index
    %c0_1 = arith.constant 0 : index
    %5 = vector.load %arg2[%c0_0, %c0_1] : memref<2x1024xf32, #tpu.memory_space<vmem>>, vector<2x1024xf32>
    %6 = math.absf %5 : vector<2x1024xf32>
    %7 = vector.shape_cast %6 : vector<2x1024xf32> to vector<1x2x1024xf32>
    %cst = arith.constant dense<0.000000e+00> : vector<1xf32>
    %8 = vector.multi_reduction <add>, %7, %cst [1, 2] : vector<1x2x1024xf32> to vector<1xf32>
    %9 = vector.shape_cast %8 : vector<1xf32> to vector<1x1x1xf32>
    %10 = vector.extract %9[0, 0, 0] : f32 from vector<1x1x1xf32>
    %cst_2 = arith.constant 2.048000e+03 : f32
    %11 = arith.divf %10, %cst_2 : f32
    %12 = arith.mulf %11, %2 : f32
    %cst_3 = arith.constant 1.000000e+00 : f32
    %13 = arith.divf %cst_3, %12 : f32
    %14 = vector.broadcast %13 : f32 to vector<2x1024xf32>
    %15 = arith.mulf %6, %14 : vector<2x1024xf32>
    %16 = vector.broadcast %4 : f32 to vector<2x1024xf32>
    %17 = arith.maximumf %16, %15 : vector<2x1024xf32>
    %18 = math.log %17 : vector<2x1024xf32>
    %19 = vector.broadcast %1 : f32 to vector<2x1024xf32>
    %20 = arith.mulf %19, %18 : vector<2x1024xf32>
    %21 = vector.broadcast %3 : f32 to vector<2x1024xf32>
    %22 = arith.minimumf %21, %20 : vector<2x1024xf32>
    %23 = vector.broadcast %0 : f32 to vector<2x1024xf32>
    %24 = arith.mulf %23, %22 : vector<2x1024xf32>
    %25 = arith.maximumf %24, %22 : vector<2x1024xf32>
    %26 = arith.mulf %5, %25 : vector<2x1024xf32>
    %c0_4 = arith.constant 0 : index
    %c0_5 = arith.constant 0 : index
    %27 = vector.load %arg3[%c0_4, %c0_5] : memref<2x1024xf32, #tpu.memory_space<vmem>>, vector<2x1024xf32>
    tpu.vector_store %arg3[%c0_4, %c0_5], %26 {strides = array<i32>} : memref<2x1024xf32, #tpu.memory_space<vmem>>, vector<2x1024xf32>,
    return
  }
  func.func @transform_0(%arg0: i32) -> i32 {
    %c0_i32 = arith.constant 0 : i32
    %c0_i32_0 = arith.constant 0 : i32
    return %c0_i32 : i32
  }
  func.func @transform_1(%arg0: i32) -> (i32, i32) {
    %c0_i32 = arith.constant 0 : i32
    %c0_i32_0 = arith.constant 0 : i32
    %c0_i32_1 = arith.constant 0 : i32
    return %c0_i32, %c0_i32_0 : i32, i32
  }
  func.func @transform_2(%arg0: i32) -> (i32, i32) {
    %c0_i32 = arith.constant 0 : i32
    %c0_i32_0 = arith.constant 0 : i32
    %c0_i32_1 = arith.constant 0 : i32
    return %c0_i32, %c0_i32_0 : i32, i32
  }
}

</mosaic_0001>

<bundles_post_ra>
// kernel: tpu_custom_call.1
= control target key start
LH: loop header
LB: loop body
LE: loop exit
PB: predicated region body
PF: predicated region fallthrough
CT: control target
= control target key end

     0   :  { %7 = vsyncpa [#allocation5], 0  ;;  %s303_s0 = inlined_call_operand.hbm [shape: f32[5], index: 0, kind: input, shape index: {}]   ;;  %s304_s1 = inlined_call_operand.hbm [shape: f32[2,1024], index: 1, kind: input, shape index: {}]   ;;  %s305_s2 = inlined_call_operand.hbm [shape: f32[2,1024], index: 2, kind: output, shape index: {}]  }
   0x1   :  { %8 = vsyncpa [#allocation3], 0 }
   0x2   :  { %9 = vsyncpa [#allocation4], 0  ;;  %s15_s11 = sshll.u32 %s303_s0, 4  ;;  %s24_s14 = sshll.u32 %s304_s1, 4  ;;  %s16_s11 = int_to_ptr.hbm [resolvable:$true] %s15_s11  ;;  %s25_s14 = int_to_ptr.hbm [resolvable:$true] %s24_s14 }
   0x3   :  { %s251_s15 = smov [#allocation2]   ;;  %s252_s16 = smov [#allocation6]  }
   0x4   :  { %18 = dma.hbm_to_smem %s16_s11, 16, %s251_s15, [#allocation5]  }
   0x5   :  { %s26_s17 = sshll.u32 %s252_s16, 4  ;;  %s27_s17 = int_to_ptr.vmem [resolvable:$true] %s26_s17 }
   0x6   :  { %29 = dma.hbm_to_vmem [thread:$0]  %s25_s14, 256, %s27_s17, [#allocation3]  }
   0x7   :  { %245 = dma.done.wait [#allocation5], 16  }
   0x8   :  { %246 = vsyncadd [#allocation5], 4294967280 }
   0x9   :  { %247 = dma.done.wait [#allocation3], 256  }
   0xa   :  { %248 = vsyncadd [#allocation3], 4294967040 }
   0xb   :  { %38 = sfence }
   0xc   :  { %v276_v0 = vld [vmem:[#allocation6] sm:$0xff]  ;;  %v278_v1 = vld [vmem:[#allocation6 + $0x8] sm:$0xff]  ;;  %vm69_vm0 = vcmask 1041408   ;;  %v253_v27 = vmov 2048.0   ;;  %s164_s0 = sld [smem:[#allocation2 + $0x2]]  ;;  %s254_s26 = smov [#allocation7]  }
   0xd   :  { %v46_v2 = vand.u32 2147483647, %v276_v0  ;;  %v47_v3 = vand.u32 2147483647, %v278_v1  ;;  %177 = vrcp.f32 %v253_v27  ;;  %s166_s21 = sld [smem:[#allocation2 + $0x4]]  ;;  %s150_s27 = sshll.u32 %s254_s26, 4  ;;  %s151_s27 = int_to_ptr.vmem [resolvable:$true] %s150_s27 }
   0xe   :  { %s163_s23 = sld [smem:[#allocation2 + $0x1]]  ;;  %s152_s30 = sshll.u32 %s305_s2, 4  ;;  %s153_s30 = int_to_ptr.hbm [resolvable:$true] %s152_s30 }
   0xf   :  { %50 = vst [vmem:[#allocation1] ss:$4 sm:$0xff] %v46_v2  ;;  %s165_s24 = sld [smem:[#allocation2 + $0x3]] }
  0x10   :  { %52 = vst [vmem:[#allocation1 + $0x20] ss:$4 sm:$0xff] %v47_v3  ;;  %s39_s25 = sld [smem:[#allocation2]] }
  0x13   :  { %v178_v28 = vpop.eup %177  ;;  %v123_v53 = vstv %s166_s21 }
  0x14   :  { %v95_v29 = vmul.f32 2048.0, %v178_v28  ;;  %vm99_vm1 = vweird.f32 %v178_v28  ;;  %v130_v59 = vstv %s163_s23 }
  0x15   :  { %v133_v63 = vstv %s165_s24 }
  0x16   :  { %v53_v4 = vld.sshfl [vmem:[#allocation1] sm:$0xff pattern:$0x73625140]  ;;  %v54_v5 = vld.sshfl [vmem:[#allocation1 + $0x8] sm:$0xff pattern:$0x73625140] }
  0x17   :  { %v55_v6 = vld.sshfl [vmem:[#allocation1 + $0x10] sm:$0xff pattern:$0x73625140]  ;;  %v56_v7 = vld.sshfl [vmem:[#allocation1 + $0x18] sm:$0xff pattern:$0x73625140] }
  0x18   :  { %v70_v8 = vsel %vm69_vm0, %v53_v4, 0.0  ;;  %v71_v9 = vsel %vm69_vm0, %v54_v5, 0.0  ;;  %v73_v10 = vsel %vm69_vm0, %v55_v6, 0.0  ;;  %v57_v11 = vld.sshfl [vmem:[#allocation1 + $0x20] sm:$0xff pattern:$0x73625140]  ;;  %v136_v6 = vstv %s39_s25 }
  0x19   :  { %v72_v12 = vadd.f32 %v71_v9, %v70_v8  ;;  %v75_v13 = vsel %vm69_vm0, %v56_v7, 0.0  ;;  %v58_v14 = vld.sshfl [vmem:[#allocation1 + $0x28] sm:$0xff pattern:$0x73625140]  ;;  %v77_v16 = vsel %vm69_vm0, %v57_v11, 0.0  ;;  %v96_v30 = vsub.f32 1.0, %v95_v29 }
  0x1a   :  { %v59_v17 = vld.sshfl [vmem:[#allocation1 + $0x30] sm:$0xff pattern:$0x73625140]  ;;  %v79_v19 = vsel %vm69_vm0, %v58_v14, 0.0 }
  0x1b   :  { %v74_v15 = vadd.f32 %v73_v10, %v72_v12  ;;  %v60_v20 = vld.sshfl [vmem:[#allocation1 + $0x38] sm:$0xff pattern:$0x73625140]  ;;  %v81_v22 = vsel %vm69_vm0, %v59_v17, 0.0  ;;  %v97_v34 = vmul.f32 %v178_v28, %v96_v30 }
  0x1c   :  { %v83_v24 = vsel %vm69_vm0, %v60_v20, 0.0 }
  0x1d   :  { %v76_v18 = vadd.f32 %v75_v13, %v74_v15  ;;  %v98_v37 = vadd.f32 %v178_v28, %v97_v34 }
  0x1f   :  { %v78_v21 = vadd.f32 %v77_v16, %v76_v18  ;;  %v100_v40 = vsel %vm99_vm1, %v178_v28, %v98_v37 }
  0x21   :  { %v80_v23 = vadd.f32 %v79_v19, %v78_v21 }
  0x23   :  { %v82_v25 = vadd.f32 %v81_v22, %v80_v23 }
  0x25   :  { %v84_v26 = vadd.f32 %v83_v24, %v82_v25 }
  0x27   :  { %85 = vadd.xlane.f32.xlu0 %v84_v26 }
  0x9a   :  { %v86_v31 = vpop.xlane.xlu0 %85 }
  0x9b   :  { %v87_v32 = vrot.slane %v86_v31, 4 }
  0x9d   :  { %v88_v33 = vadd.f32 %v87_v32, %v86_v31 }
  0x9f   :  { %v89_v35 = vrot.slane %v88_v33, 2 }
  0xa1   :  { %v90_v36 = vadd.f32 %v89_v35, %v88_v33 }
  0xa3   :  { %v91_v38 = vrot.slane %v90_v36, 1 }
  0xa5   :  { %v92_v39 = vadd.f32 %v91_v38, %v90_v36 }
  0xa7   :  { %167 = vpush %v92_v39 }
  0xa8   :  { %169 = vpush %v100_v40 }
  0xd8   :  { %s168_s1 = spop %167 }
  0xd9   :  { %s170_s18 = spop %169 }
  0xda   :  { %s102_s19 = smul.f32 %s170_s18, %s168_s1 }
  0xdc   :  { %s103_s20 = smul.f32 %s164_s0, %s102_s19 }
  0xde   :  { %v104_v41 = vstv %s103_s20 }
  0xdf   :  { %179 = vrcp.f32 %v104_v41  ;;  %v116_v45 = vand.u32 2147483648, %v104_v41  ;;  %v114_v47 = vand.u32 2147483647, %v104_v41  ;;  %vm110_vm3 = vweird.f32 %v104_v41 }
  0xe1   :  { %v117_v49 = vor.u32 1.1754944e-38, %v116_v45  ;;  %vm115_vm5 = vcmp.eq.f32.partialorder %v114_v47, 8.507059e+37 }
  0xe5   :  { %v180_v42 = vpop.eup %179 }
  0xe6   :  { %v106_v43 = vmul.f32 %v180_v42, %v104_v41  ;;  %vm111_vm2 = vweird.f32 %v180_v42 }
  0xe7   :  { %vm112_vm4 = vmor %vm110_vm3, %vm111_vm2 }
  0xe8   :  { %v107_v44 = vsub.f32 1.0, %v106_v43 }
  0xea   :  { %v108_v46 = vmul.f32 %v180_v42, %v107_v44 }
  0xec   :  { %v109_v48 = vadd.f32 %v180_v42, %v108_v46 }
  0xee   :  { %v113_v50 = vsel %vm112_vm4, %v180_v42, %v109_v48 }
  0xef   :  { %v118_v51 = vsel %vm115_vm5, %v117_v49, %v113_v50 }
  0xf0   :  { %171 = vpush %v118_v51 }
 0x121   :  { %s172_s22 = spop %171 }
 0x122   :  { %v120_v52 = vstv %s172_s22 }
 0x123   :  { %v121_v54 = vmul.f32 %v120_v52, %v46_v2  ;;  %v122_v55 = vmul.f32 %v120_v52, %v47_v3 }
 0x125   :  { %v124_v56 = vmax.f32 %v123_v53, %v121_v54  ;;  %v125_v57 = vmax.f32 %v123_v53, %v122_v55 }
 0x127   :  { %181 = vlog2.f32 %v124_v56 }
 0x128   :  { %183 = vlog2.f32 %v125_v57 }
 0x12d   :  { %v182_v58 = vpop.eup %181 }
 0x12e   :  { %v184_v60 = vpop.eup %183  ;;  %v127_v61 = vmul.f32 0.6931472, %v182_v58 }
 0x12f   :  { %v129_v62 = vmul.f32 0.6931472, %v184_v60 }
 0x130   :  { %v131_v4 = vmul.f32 %v130_v59, %v127_v61 }
 0x131   :  { %v132_v5 = vmul.f32 %v130_v59, %v129_v62 }
 0x132   :  { %v134_v2 = vmin.f32 %v133_v63, %v131_v4 }
 0x133   :  { %v135_v7 = vmin.f32 %v133_v63, %v132_v5 }
 0x134   :  { %v137_v8 = vmul.f32 %v136_v6, %v134_v2 }
 0x135   :  { %v138_v3 = vmul.f32 %v136_v6, %v135_v7 }
 0x136   :  { %v139_v9 = vmax.f32 %v137_v8, %v134_v2 }
 0x137   :  { %v140_v10 = vmax.f32 %v138_v3, %v135_v7 }
 0x138   :  { %v141_v11 = vmul.f32 %v139_v9, %v276_v0 }
 0x139   :  { %v142_v12 = vmul.f32 %v140_v10, %v278_v1 }
 0x13a   :  { %143 = vst [vmem:[#allocation7] sm:$0xff] %v141_v11 }
 0x13b   :  { %144 = vst [vmem:[#allocation7 + $0x8] sm:$0xff] %v142_v12 }
 0x13c   :  { %155 = dma.vmem_to_hbm [thread:$0]  %s151_s27, 256, %s153_s30, [#allocation4]  }
 0x13d   :  { %249 = dma.done.wait [#allocation4], 256  }
 0x13e   :  { %250 = vsyncadd [#allocation4], 4294967040 }
 0x13f   :  { %160 = vsyncpa [#allocation3], 1 }
 0x140   :  { %161 = vsyncpa [#allocation4], 1 }
 0x141   :  { %162 = vsyncpa [#allocation5], 1 }

</bundles_post_ra>
